<compile_context>
chip_gen: v7x
topology: tpu7x:2x2x1
jax: 0.10.0
libtpu: 0.0.40
codegen_flags: <defaults>
</compile_context>

<pallas_src>
import functools

import jax
import jax.numpy as jnp
from jax.experimental import pallas as pl
from jax.experimental.pallas import tpu as pltpu

LN_EPS = 1e-5   # torch.nn.LayerNorm default
LANE = 128      # TPU lane width
SUBLANE = 8     # f32 sublane width


def _round_up(x, m):
    return (x + m - 1) // m * m


def _cdiv(a, b):
    return -(-a // b)


# ----------------------------------------------------------------------------
# Fused kernel: the whole [Linear -> LayerNorm -> ReLU] * n stack in one body.
# ----------------------------------------------------------------------------
def _make_fused_kernel(true_out_dims):
    """true_out_dims[l] = un-padded output width of layer l (for LN statistics)."""
    n_layers = len(true_out_dims)

    def kernel(x_ref, *rest):
        # rest = [w0, b0, g0, be0, w1, b1, g1, be1, ..., o_ref]
        o_ref = rest[-1]
        param_refs = rest[:-1]

        h = x_ref[...]
        # NOTE: static unroll (n_layers is small).  For very deep/wide stacks
        # on v7x check the bundle for vld/vst saturation / spill and reduce tm.
        for l in range(n_layers):
            w_ref, b_ref, g_ref, be_ref = param_refs[4 * l: 4 * l + 4]
            w = w_ref[...]

            # ---- Linear (MXU): bf16 operands on the fast path, f32 accumulate.
            y = jnp.dot(h.astype(w.dtype), w, preferred_element_type=jnp.float32)
            y = y + b_ref[...]                         # bias is f32, (1, doutp)

            doutp = y.shape[-1]
            inv_d = jnp.float32(1.0 / float(true_out_dims[l]))

            # ---- LayerNorm statistics over the TRUE feature width (padded
            # ---- columns are exactly 0 so they contribute nothing).
            # Fast path (bf16 weights, narrow layer): offload the row sums to
            # the idle MXU so only the y*y pass remains on the VPU.
            if w.dtype == jnp.bfloat16 and doutp <= 512:
                ones_col = jnp.ones((doutp, 1), jnp.float32)
                s = jnp.dot(y, ones_col, preferred_element_type=jnp.float32)
                ss = jnp.dot(y * y, ones_col, preferred_element_type=jnp.float32)
            else:
                s = jnp.sum(y, axis=-1, keepdims=True)
                ss = jnp.sum(y * y, axis=-1, keepdims=True)

            mean = s * inv_d
            var = jnp.maximum(ss * inv_d - mean * mean, jnp.float32(0.0))
            ynorm = (y - mean) * jax.lax.rsqrt(var + jnp.float32(LN_EPS))
            ynorm = ynorm * g_ref[...] + be_ref[...]   # padded gamma/beta are 0
            # ---- ReLU
            h = jnp.maximum(ynorm, jnp.float32(0.0))

        o_ref[...] = h.astype(o_ref.dtype)

    return kernel


# ----------------------------------------------------------------------------
# Parameter preparation: pad feature dims to multiples of 128 once, up front.
# ----------------------------------------------------------------------------
def prepare_mlp_n_params(params, compute_dtype=jnp.bfloat16):
    """Pad every layer's params to lane-aligned shapes.

    params : list of (w(din,dout), b(dout,), gamma(dout,), beta(dout,))
    compute_dtype : dtype of the matmul operands (bf16 default = fast path).
    Returns (flat_padded_params, dims) where dims = [d0, d1, ..., dn] are the
    true (un-padded) layer widths.
    """
    flat = []
    dims = [params[0][0].shape[0]]
    for (w, b, g, be) in params:
        din, dout = w.shape
        dims.append(dout)
        dinp, doutp = _round_up(din, LANE), _round_up(dout, LANE)
        wp = jnp.zeros((dinp, doutp), compute_dtype).at[:din, :dout].set(
            w.astype(compute_dtype))
        # bias / gamma / beta stay f32 (LayerNorm math is f32 on all chips).
        bp = jnp.zeros((1, doutp), jnp.float32).at[0, :dout].set(b.astype(jnp.float32))
        gp = jnp.zeros((1, doutp), jnp.float32).at[0, :dout].set(g.astype(jnp.float32))
        bep = jnp.zeros((1, doutp), jnp.float32).at[0, :dout].set(be.astype(jnp.float32))
        flat += [wp, bp, gp, bep]
    return flat, dims


# ----------------------------------------------------------------------------
# VMEM budgeting helpers.
# ----------------------------------------------------------------------------
def _vmem_physical_bytes():
    try:
        return int(pltpu.get_tpu_info().vmem_capacity_bytes)
    except Exception:
        return 64 * 1024 * 1024   # conservative fallback (v7x per-TC VMEM)


def _make_resident_spec_factory():
    """BlockSpec factory for grid-invariant params; single-buffered if possible."""
    if hasattr(pl, "Buffered"):
        try:
            pl.BlockSpec((1, 1), lambda i: (0, 0),
                         pipeline_mode=pl.Buffered(buffer_count=1))

            def factory(shape):
                return pl.BlockSpec(shape, lambda i: (0, 0),
                                    pipeline_mode=pl.Buffered(buffer_count=1))
            return factory, 1
        except TypeError:
            pass
    return (lambda shape: pl.BlockSpec(shape, lambda i: (0, 0))), 2


# ----------------------------------------------------------------------------
# Forward wrapper: one fused pallas_call, gridded over balanced batch tiles.
# ----------------------------------------------------------------------------
@functools.partial(jax.jit, static_argnames=("dims", "block_m"))
def _fused_call(x, flat_params, dims, block_m):
    dims = list(dims)
    n_layers = len(dims) - 1
    B, d0 = x.shape
    padded = [_round_up(d, LANE) for d in dims]
    d0p, dLp = padded[0], padded[-1]

    resident_spec, param_buf = _make_resident_spec_factory()
    w_itemsize = jnp.dtype(flat_params[0].dtype).itemsize
    x_itemsize = jnp.dtype(x.dtype).itemsize

    # ---- Balanced batch tiling (avoid near-2x padding for B just over block_m).
    B8 = _round_up(B, SUBLANE)
    n_steps = max(1, _cdiv(B8, block_m))
    # v7x megacore: give the "parallel" batch axis >= 2 steps when possible.
    if n_steps == 1 and B8 >= 2 * SUBLANE:
        n_steps = 2
    tm = _round_up(_cdiv(B8, n_steps), SUBLANE)

    # ---- VMEM footprint: resident params (single- or double-buffered) +
    # ---- double-buffered input/output tiles + per-layer f32 temporaries.
    def _needed(tm_):
        p = sum(a * b * w_itemsize + 3 * b * 4
                for a, b in zip(padded[:-1], padded[1:])) * param_buf
        io = 2 * tm_ * d0p * x_itemsize + 2 * tm_ * dLp * x_itemsize
        tmp = 4 * tm_ * max(padded) * 4
        return p + io + tmp

    physical = _vmem_physical_bytes()
    budget = int(physical * 0.9)   # headroom for compiler-internal scratch
    # Capacity check: shrink the batch tile until the resident design fits.
    while _needed(tm) > budget and tm > SUBLANE:
        n_steps += 1
        tm = _round_up(_cdiv(B8, n_steps), SUBLANE)
    # TODO(synk): if the resident parameters alone still exceed VMEM, tile the
    # widest layer over its output dim (extra grid axis + accumulator scratch).

    n_steps = _cdiv(B8, tm)
    Bp = n_steps * tm

    # Skip the wrapper-side pad entirely when shapes already line up.
    if Bp == B and d0p == d0:
        xp = x
    else:
        xp = jnp.zeros((Bp, d0p), x.dtype).at[:B, :d0].set(x)

    in_specs = [pl.BlockSpec((tm, d0p), lambda i: (i, 0))]
    for l in range(n_layers):
        dinp, doutp = padded[l], padded[l + 1]
        # Weights / LN params: same block every grid step -> DMA'd once,
        # resident, and single-buffered (pl.Buffered(1)) when supported.
        in_specs.append(resident_spec((dinp, doutp)))
        in_specs += [resident_spec((1, doutp))] * 3
    out_spec = pl.BlockSpec((tm, dLp), lambda i: (i, 0))

    vmem_limit = int(min(physical, max(_needed(tm) + (4 << 20), 32 << 20)))

    out = pl.pallas_call(
        _make_fused_kernel(tuple(dims[1:])),
        out_shape=jax.ShapeDtypeStruct((Bp, dLp), x.dtype),
        grid=(n_steps,),
        in_specs=in_specs,
        out_specs=out_spec,
        compiler_params=pltpu.CompilerParams(
            dimension_semantics=("parallel",),
            vmem_limit_bytes=vmem_limit),
    )(xp, *flat_params)

    if Bp == B and dLp == dims[-1]:
        return out
    return out[:B, :dims[-1]]


def mlp_n_forward(x, prepared, *, block_m=512):
    flat_params, dims = prepared
    return _fused_call(x, flat_params, dims=tuple(dims), block_m=block_m)


# ----------------------------------------------------------------------------
# Synthetic parameter init (shapes match nn.Linear / nn.LayerNorm).
# ----------------------------------------------------------------------------
def init_mlp_n_params(key, fcn_dim, dtype=jnp.float32):
    params = []
    for i in range(len(fcn_dim) - 1):
        din, dout = fcn_dim[i], fcn_dim[i + 1]
        key, kw, kb = jax.random.split(key, 3)
        bound = 1.0 / jnp.sqrt(din)
        w = jax.random.uniform(kw, (din, dout), dtype, -bound, bound)
        b = jax.random.uniform(kb, (dout,), dtype, -bound, bound)
        gamma = jnp.ones((dout,), dtype)   # LayerNorm weight init
        beta = jnp.zeros((dout,), dtype)   # LayerNorm bias init
        params.append((w, b, gamma, beta))
    return params


def _reference_forward(x, params):
    """Pure-JAX reference (f32) for correctness checking."""
    out = x
    for (w, b, gamma, beta) in params:
        y = out @ w + b
        mean = jnp.mean(y, axis=-1, keepdims=True)
        var = jnp.mean((y - mean) ** 2, axis=-1, keepdims=True)
        y = (y - mean) / jnp.sqrt(var + LN_EPS) * gamma + beta
        out = jnp.maximum(y, 0.0)
    return out


if __name__ == "__main__":
    key = jax.random.PRNGKey(0)
    fcn_dim = [32, 64, 32, 16]     # small analogue of e.g. [1024,512,512,256,256,64]

    params = init_mlp_n_params(key, fcn_dim)
    prep_f32 = prepare_mlp_n_params(params, compute_dtype=jnp.float32)
    prep_bf16 = prepare_mlp_n_params(params)        # bf16 weights (default fast path)

    # batch=8 : single grid step.  batch=20 : balanced 2-step grid (megacore path)
    # plus row padding / output slicing.
    for batch in (8, 20):
        key, kx = jax.random.split(key)
        x = jax.random.normal(kx, (batch, fcn_dim[0]), jnp.float32)
        ref = _reference_forward(x, params)

        # f32 weights: must match the f32 reference tightly.
        out_f32 = jax.block_until_ready(mlp_n_forward(x, prep_f32))
        assert out_f32.shape == (batch, fcn_dim[-1])
        assert jnp.allclose(out_f32, ref, atol=1e-4, rtol=1e-4), \
            f"f32 mismatch vs reference (batch={batch})"

        # bf16 matmul operands, f32 LayerNorm: loose tolerance vs f32 reference.
        # (Activation is re-quantized to bf16 before each layer's matmul, so
        # error compounds with depth by design.)
        out_bf16 = jax.block_until_ready(mlp_n_forward(x, prep_bf16))
        assert out_bf16.shape == (batch, fcn_dim[-1])
        assert jnp.allclose(out_bf16.astype(jnp.float32), ref, atol=1e-1, rtol=1e-1), \
            f"bf16 mismatch vs reference (batch={batch})"

    print("KERNEL_OK")
</pallas_src>

<mosaic_0001>
module attributes {stable_mosaic.version = 11 : i64} {
  func.func @kernel(%arg0: i32, %arg1: memref<8x128xf32, #tpu.memory_space<vmem>>, %arg2: memref<128x128xf32, #tpu.memory_space<vmem>>, %arg3: memref<1x128xf32, #tpu.memory_space<vmem>>, %arg4: memref<1x128xf32, #tpu.memory_space<vmem>>, %arg5: memref<1x128xf32, #tpu.memory_space<vmem>>, %arg6: memref<128x128xf32, #tpu.memory_space<vmem>>, %arg7: memref<1x128xf32, #tpu.memory_space<vmem>>, %arg8: memref<1x128xf32, #tpu.memory_space<vmem>>, %arg9: memref<1x128xf32, #tpu.memory_space<vmem>>, %arg10: memref<128x128xf32, #tpu.memory_space<vmem>>, %arg11: memref<1x128xf32, #tpu.memory_space<vmem>>, %arg12: memref<1x128xf32, #tpu.memory_space<vmem>>, %arg13: memref<1x128xf32, #tpu.memory_space<vmem>>, %arg14: memref<8x128xf32, #tpu.memory_space<vmem>>) attributes {dimension_semantics = [#tpu.dimension_semantics<parallel>], iteration_bounds = array<i64: 1>, scalar_prefetch = 0 : i64, scratch_operands = 0 : i64, tpu.core_type = #tpu.core_type<tc>, window_params = [{transform_indices = @transform_0, window_bounds = array<i64: 8, 128>}, {pipeline_mode = #tpu.pipeline_mode<synchronous>, transform_indices = @transform_1, window_bounds = array<i64: 128, 128>}, {pipeline_mode = #tpu.pipeline_mode<synchronous>, transform_indices = @transform_2, window_bounds = array<i64: 1, 128>}, {pipeline_mode = #tpu.pipeline_mode<synchronous>, transform_indices = @transform_3, window_bounds = array<i64: 1, 128>}, {pipeline_mode = #tpu.pipeline_mode<synchronous>, transform_indices = @transform_4, window_bounds = array<i64: 1, 128>}, {pipeline_mode = #tpu.pipeline_mode<synchronous>, transform_indices = @transform_5, window_bounds = array<i64: 128, 128>}, {pipeline_mode = #tpu.pipeline_mode<synchronous>, transform_indices = @transform_6, window_bounds = array<i64: 1, 128>}, {pipeline_mode = #tpu.pipeline_mode<synchronous>, transform_indices = @transform_7, window_bounds = array<i64: 1, 128>}, {pipeline_mode = #tpu.pipeline_mode<synchronous>, transform_indices = @transform_8, window_bounds = array<i64: 1, 128>}, {pipeline_mode = #tpu.pipeline_mode<synchronous>, transform_indices = @transform_9, window_bounds = array<i64: 128, 128>}, {pipeline_mode = #tpu.pipeline_mode<synchronous>, transform_indices = @transform_10, window_bounds = array<i64: 1, 128>}, {pipeline_mode = #tpu.pipeline_mode<synchronous>, transform_indices = @transform_11, window_bounds = array<i64: 1, 128>}, {pipeline_mode = #tpu.pipeline_mode<synchronous>, transform_indices = @transform_12, window_bounds = array<i64: 1, 128>}, {transform_indices = @transform_13, window_bounds = array<i64: 8, 128>}]} {
    %c0 = arith.constant 0 : index
    %c0_0 = arith.constant 0 : index
    %0 = vector.load %arg1[%c0, %c0_0] : memref<8x128xf32, #tpu.memory_space<vmem>>, vector<8x128xf32>
    %c0_1 = arith.constant 0 : index
    %c0_2 = arith.constant 0 : index
    %1 = vector.load %arg2[%c0_1, %c0_2] : memref<128x128xf32, #tpu.memory_space<vmem>>, vector<128x128xf32>
    %cst = arith.constant dense<0.000000e+00> : vector<8x128xf32>
    %2 = tpu.matmul %0, %1, %cst {dimension_numbers = #tpu.dot_dimension_numbers<[1], [0], [0], [1], [0, 0, 1, 1], [], []>} : vector<8x128xf32>, vector<128x128xf32>, vector<8x128xf32> -> vector<8x128xf32>
    %c0_3 = arith.constant 0 : index
    %c0_4 = arith.constant 0 : index
    %3 = vector.load %arg3[%c0_3, %c0_4] : memref<1x128xf32, #tpu.memory_space<vmem>>, vector<1x128xf32>
    %4 = vector.broadcast %3 : vector<1x128xf32> to vector<8x128xf32>
    %5 = arith.addf %2, %4 : vector<8x128xf32>
    %cst_5 = arith.constant dense<0.000000e+00> : vector<8xf32>
    %6 = vector.multi_reduction <add>, %5, %cst_5 [1] : vector<8x128xf32> to vector<8xf32>
    %7 = vector.shape_cast %6 : vector<8xf32> to vector<8x1xf32>
    %8 = arith.mulf %5, %5 : vector<8x128xf32>
    %cst_6 = arith.constant dense<0.000000e+00> : vector<8xf32>
    %9 = vector.multi_reduction <add>, %8, %cst_6 [1] : vector<8x128xf32> to vector<8xf32>
    %10 = vector.shape_cast %9 : vector<8xf32> to vector<8x1xf32>
    %cst_7 = arith.constant 1.562500e-02 : f32
    %11 = vector.broadcast %cst_7 : f32 to vector<8x1xf32>
    %12 = arith.mulf %7, %11 : vector<8x1xf32>
    %cst_8 = arith.constant 1.562500e-02 : f32
    %13 = vector.broadcast %cst_8 : f32 to vector<8x1xf32>
    %14 = arith.mulf %10, %13 : vector<8x1xf32>
    %15 = arith.mulf %12, %12 : vector<8x1xf32>
    %16 = arith.subf %14, %15 : vector<8x1xf32>
    %cst_9 = arith.constant 0.000000e+00 : f32
    %17 = vector.broadcast %cst_9 : f32 to vector<8x1xf32>
    %18 = arith.maximumf %16, %17 : vector<8x1xf32>
    %19 = vector.broadcast %12 : vector<8x1xf32> to vector<8x128xf32>
    %20 = arith.subf %5, %19 : vector<8x128xf32>
    %cst_10 = arith.constant 9.99999974E-6 : f32
    %21 = vector.broadcast %cst_10 : f32 to vector<8x1xf32>
    %22 = arith.addf %18, %21 : vector<8x1xf32>
    %23 = math.rsqrt %22 : vector<8x1xf32>
    %24 = vector.broadcast %23 : vector<8x1xf32> to vector<8x128xf32>
    %25 = arith.mulf %20, %24 : vector<8x128xf32>
    %c0_11 = arith.constant 0 : index
    %c0_12 = arith.constant 0 : index
    %26 = vector.load %arg4[%c0_11, %c0_12] : memref<1x128xf32, #tpu.memory_space<vmem>>, vector<1x128xf32>
    %27 = vector.broadcast %26 : vector<1x128xf32> to vector<8x128xf32>
    %28 = arith.mulf %25, %27 : vector<8x128xf32>
    %c0_13 = arith.constant 0 : index
    %c0_14 = arith.constant 0 : index
    %29 = vector.load %arg5[%c0_13, %c0_14] : memref<1x128xf32, #tpu.memory_space<vmem>>, vector<1x128xf32>
    %30 = vector.broadcast %29 : vector<1x128xf32> to vector<8x128xf32>
    %31 = arith.addf %28, %30 : vector<8x128xf32>
    %cst_15 = arith.constant 0.000000e+00 : f32
    %32 = vector.broadcast %cst_15 : f32 to vector<8x128xf32>
    %33 = arith.maximumf %31, %32 : vector<8x128xf32>
    %c0_16 = arith.constant 0 : index
    %c0_17 = arith.constant 0 : index
    %34 = vector.load %arg6[%c0_16, %c0_17] : memref<128x128xf32, #tpu.memory_space<vmem>>, vector<128x128xf32>
    %cst_18 = arith.constant dense<0.000000e+00> : vector<8x128xf32>
    %35 = tpu.matmul %33, %34, %cst_18 {dimension_numbers = #tpu.dot_dimension_numbers<[1], [0], [0], [1], [0, 0, 1, 1], [], []>} : vector<8x128xf32>, vector<128x128xf32>, vector<8x128xf32> -> vector<8x128xf32>
    %c0_19 = arith.constant 0 : index
    %c0_20 = arith.constant 0 : index
    %36 = vector.load %arg7[%c0_19, %c0_20] : memref<1x128xf32, #tpu.memory_space<vmem>>, vector<1x128xf32>
    %37 = vector.broadcast %36 : vector<1x128xf32> to vector<8x128xf32>
    %38 = arith.addf %35, %37 : vector<8x128xf32>
    %cst_21 = arith.constant dense<0.000000e+00> : vector<8xf32>
    %39 = vector.multi_reduction <add>, %38, %cst_21 [1] : vector<8x128xf32> to vector<8xf32>
    %40 = vector.shape_cast %39 : vector<8xf32> to vector<8x1xf32>
    %41 = arith.mulf %38, %38 : vector<8x128xf32>
    %cst_22 = arith.constant dense<0.000000e+00> : vector<8xf32>
    %42 = vector.multi_reduction <add>, %41, %cst_22 [1] : vector<8x128xf32> to vector<8xf32>
    %43 = vector.shape_cast %42 : vector<8xf32> to vector<8x1xf32>
    %cst_23 = arith.constant 3.125000e-02 : f32
    %44 = vector.broadcast %cst_23 : f32 to vector<8x1xf32>
    %45 = arith.mulf %40, %44 : vector<8x1xf32>
    %cst_24 = arith.constant 3.125000e-02 : f32
    %46 = vector.broadcast %cst_24 : f32 to vector<8x1xf32>
    %47 = arith.mulf %43, %46 : vector<8x1xf32>
    %48 = arith.mulf %45, %45 : vector<8x1xf32>
    %49 = arith.subf %47, %48 : vector<8x1xf32>
    %cst_25 = arith.constant 0.000000e+00 : f32
    %50 = vector.broadcast %cst_25 : f32 to vector<8x1xf32>
    %51 = arith.maximumf %49, %50 : vector<8x1xf32>
    %52 = vector.broadcast %45 : vector<8x1xf32> to vector<8x128xf32>
    %53 = arith.subf %38, %52 : vector<8x128xf32>
    %cst_26 = arith.constant 9.99999974E-6 : f32
    %54 = vector.broadcast %cst_26 : f32 to vector<8x1xf32>
    %55 = arith.addf %51, %54 : vector<8x1xf32>
    %56 = math.rsqrt %55 : vector<8x1xf32>
    %57 = vector.broadcast %56 : vector<8x1xf32> to vector<8x128xf32>
    %58 = arith.mulf %53, %57 : vector<8x128xf32>
    %c0_27 = arith.constant 0 : index
    %c0_28 = arith.constant 0 : index
    %59 = vector.load %arg8[%c0_27, %c0_28] : memref<1x128xf32, #tpu.memory_space<vmem>>, vector<1x128xf32>
    %60 = vector.broadcast %59 : vector<1x128xf32> to vector<8x128xf32>
    %61 = arith.mulf %58, %60 : vector<8x128xf32>
    %c0_29 = arith.constant 0 : index
    %c0_30 = arith.constant 0 : index
    %62 = vector.load %arg9[%c0_29, %c0_30] : memref<1x128xf32, #tpu.memory_space<vmem>>, vector<1x128xf32>
    %63 = vector.broadcast %62 : vector<1x128xf32> to vector<8x128xf32>
    %64 = arith.addf %61, %63 : vector<8x128xf32>
    %cst_31 = arith.constant 0.000000e+00 : f32
    %65 = vector.broadcast %cst_31 : f32 to vector<8x128xf32>
    %66 = arith.maximumf %64, %65 : vector<8x128xf32>
    %c0_32 = arith.constant 0 : index
    %c0_33 = arith.constant 0 : index
    %67 = vector.load %arg10[%c0_32, %c0_33] : memref<128x128xf32, #tpu.memory_space<vmem>>, vector<128x128xf32>
    %cst_34 = arith.constant dense<0.000000e+00> : vector<8x128xf32>
    %68 = tpu.matmul %66, %67, %cst_34 {dimension_numbers = #tpu.dot_dimension_numbers<[1], [0], [0], [1], [0, 0, 1, 1], [], []>} : vector<8x128xf32>, vector<128x128xf32>, vector<8x128xf32> -> vector<8x128xf32>
    %c0_35 = arith.constant 0 : index
    %c0_36 = arith.constant 0 : index
    %69 = vector.load %arg11[%c0_35, %c0_36] : memref<1x128xf32, #tpu.memory_space<vmem>>, vector<1x128xf32>
    %70 = vector.broadcast %69 : vector<1x128xf32> to vector<8x128xf32>
    %71 = arith.addf %68, %70 : vector<8x128xf32>
    %cst_37 = arith.constant dense<0.000000e+00> : vector<8xf32>
    %72 = vector.multi_reduction <add>, %71, %cst_37 [1] : vector<8x128xf32> to vector<8xf32>
    %73 = vector.shape_cast %72 : vector<8xf32> to vector<8x1xf32>
    %74 = arith.mulf %71, %71 : vector<8x128xf32>
    %cst_38 = arith.constant dense<0.000000e+00> : vector<8xf32>
    %75 = vector.multi_reduction <add>, %74, %cst_38 [1] : vector<8x128xf32> to vector<8xf32>
    %76 = vector.shape_cast %75 : vector<8xf32> to vector<8x1xf32>
    %cst_39 = arith.constant 6.250000e-02 : f32
    %77 = vector.broadcast %cst_39 : f32 to vector<8x1xf32>
    %78 = arith.mulf %73, %77 : vector<8x1xf32>
    %cst_40 = arith.constant 6.250000e-02 : f32
    %79 = vector.broadcast %cst_40 : f32 to vector<8x1xf32>
    %80 = arith.mulf %76, %79 : vector<8x1xf32>
    %81 = arith.mulf %78, %78 : vector<8x1xf32>
    %82 = arith.subf %80, %81 : vector<8x1xf32>
    %cst_41 = arith.constant 0.000000e+00 : f32
    %83 = vector.broadcast %cst_41 : f32 to vector<8x1xf32>
    %84 = arith.maximumf %82, %83 : vector<8x1xf32>
    %85 = vector.broadcast %78 : vector<8x1xf32> to vector<8x128xf32>
    %86 = arith.subf %71, %85 : vector<8x128xf32>
    %cst_42 = arith.constant 9.99999974E-6 : f32
    %87 = vector.broadcast %cst_42 : f32 to vector<8x1xf32>
    %88 = arith.addf %84, %87 : vector<8x1xf32>
    %89 = math.rsqrt %88 : vector<8x1xf32>
    %90 = vector.broadcast %89 : vector<8x1xf32> to vector<8x128xf32>
    %91 = arith.mulf %86, %90 : vector<8x128xf32>
    %c0_43 = arith.constant 0 : index
    %c0_44 = arith.constant 0 : index
    %92 = vector.load %arg12[%c0_43, %c0_44] : memref<1x128xf32, #tpu.memory_space<vmem>>, vector<1x128xf32>
    %93 = vector.broadcast %92 : vector<1x128xf32> to vector<8x128xf32>
    %94 = arith.mulf %91, %93 : vector<8x128xf32>
    %c0_45 = arith.constant 0 : index
    %c0_46 = arith.constant 0 : index
    %95 = vector.load %arg13[%c0_45, %c0_46] : memref<1x128xf32, #tpu.memory_space<vmem>>, vector<1x128xf32>
    %96 = vector.broadcast %95 : vector<1x128xf32> to vector<8x128xf32>
    %97 = arith.addf %94, %96 : vector<8x128xf32>
    %cst_47 = arith.constant 0.000000e+00 : f32
    %98 = vector.broadcast %cst_47 : f32 to vector<8x128xf32>
    %99 = arith.maximumf %97, %98 : vector<8x128xf32>
    %c0_48 = arith.constant 0 : index
    %c0_49 = arith.constant 0 : index
    %100 = vector.load %arg14[%c0_48, %c0_49] : memref<8x128xf32, #tpu.memory_space<vmem>>, vector<8x128xf32>
    tpu.vector_store %arg14[%c0_48, %c0_49], %99 {strides = array<i32>} : memref<8x128xf32, #tpu.memory_space<vmem>>, vector<8x128xf32>,
    return
  }
  func.func @transform_0(%arg0: i32) -> (i32, i32) {
    %c0_i32 = arith.constant 0 : i32
    %c0_i32_0 = arith.constant 0 : i32
    return %arg0, %c0_i32 : i32, i32
  }
  func.func @transform_1(%arg0: i32) -> (i32, i32) {
    %c0_i32 = arith.constant 0 : i32
    %c0_i32_0 = arith.constant 0 : i32
    %c0_i32_1 = arith.constant 0 : i32
    return %c0_i32, %c0_i32_0 : i32, i32
  }
  func.func @transform_2(%arg0: i32) -> (i32, i32) {
    %c0_i32 = arith.constant 0 : i32
    %c0_i32_0 = arith.constant 0 : i32
    %c0_i32_1 = arith.constant 0 : i32
    return %c0_i32, %c0_i32_0 : i32, i32
  }
  func.func @transform_3(%arg0: i32) -> (i32, i32) {
    %c0_i32 = arith.constant 0 : i32
    %c0_i32_0 = arith.constant 0 : i32
    %c0_i32_1 = arith.constant 0 : i32
    return %c0_i32, %c0_i32_0 : i32, i32
  }
  func.func @transform_4(%arg0: i32) -> (i32, i32) {
    %c0_i32 = arith.constant 0 : i32
    %c0_i32_0 = arith.constant 0 : i32
    %c0_i32_1 = arith.constant 0 : i32
    return %c0_i32, %c0_i32_0 : i32, i32
  }
  func.func @transform_5(%arg0: i32) -> (i32, i32) {
    %c0_i32 = arith.constant 0 : i32
    %c0_i32_0 = arith.constant 0 : i32
    %c0_i32_1 = arith.constant 0 : i32
    return %c0_i32, %c0_i32_0 : i32, i32
  }
  func.func @transform_6(%arg0: i32) -> (i32, i32) {
    %c0_i32 = arith.constant 0 : i32
    %c0_i32_0 = arith.constant 0 : i32
    %c0_i32_1 = arith.constant 0 : i32
    return %c0_i32, %c0_i32_0 : i32, i32
  }
  func.func @transform_7(%arg0: i32) -> (i32, i32) {
    %c0_i32 = arith.constant 0 : i32
    %c0_i32_0 = arith.constant 0 : i32
    %c0_i32_1 = arith.constant 0 : i32
    return %c0_i32, %c0_i32_0 : i32, i32
  }
  func.func @transform_8(%arg0: i32) -> (i32, i32) {
    %c0_i32 = arith.constant 0 : i32
    %c0_i32_0 = arith.constant 0 : i32
    %c0_i32_1 = arith.constant 0 : i32
    return %c0_i32, %c0_i32_0 : i32, i32
  }
  func.func @transform_9(%arg0: i32) -> (i32, i32) {
    %c0_i32 = arith.constant 0 : i32
    %c0_i32_0 = arith.constant 0 : i32
    %c0_i32_1 = arith.constant 0 : i32
    return %c0_i32, %c0_i32_0 : i32, i32
  }
  func.func @transform_10(%arg0: i32) -> (i32, i32) {
    %c0_i32 = arith.constant 0 : i32
    %c0_i32_0 = arith.constant 0 : i32
    %c0_i32_1 = arith.constant 0 : i32
    return %c0_i32, %c0_i32_0 : i32, i32
  }
  func.func @transform_11(%arg0: i32) -> (i32, i32) {
    %c0_i32 = arith.constant 0 : i32
    %c0_i32_0 = arith.constant 0 : i32
    %c0_i32_1 = arith.constant 0 : i32
    return %c0_i32, %c0_i32_0 : i32, i32
  }
  func.func @transform_12(%arg0: i32) -> (i32, i32) {
    %c0_i32 = arith.constant 0 : i32
    %c0_i32_0 = arith.constant 0 : i32
    %c0_i32_1 = arith.constant 0 : i32
    return %c0_i32, %c0_i32_0 : i32, i32
  }
  func.func @transform_13(%arg0: i32) -> (i32, i32) {
    %c0_i32 = arith.constant 0 : i32
    %c0_i32_0 = arith.constant 0 : i32
    return %arg0, %c0_i32 : i32, i32
  }
}

</mosaic_0001>

<bundles_post_ra>
// kernel: _fused_call.1
= control target key start
LH: loop header
LB: loop body
LE: loop exit
PB: predicated region body
PF: predicated region fallthrough
CT: control target
= control target key end

     0   :  { %18 = vsyncpa [#allocation3], 0  ;;  %s1022_s0 = inlined_call_operand.vmem [shape: f32[8,128], index: 0, kind: input, shape index: {}]   ;;  %s1023_s1 = inlined_call_operand.hbm [shape: f32[128,128], index: 1, kind: input, shape index: {}]   ;;  %s1024_s2 = inlined_call_operand.vmem [shape: f32[1,128], index: 2, kind: input, shape index: {}]   ;;  %s1025_s3 = inlined_call_operand.vmem [shape: f32[1,128], index: 3, kind: input, shape index: {}]   ;;  %s1026_s4 = inlined_call_operand.vmem [shape: f32[1,128], index: 4, kind: input, shape index: {}]   ;;  %s1027_s5 = inlined_call_operand.hbm [shape: f32[128,128], index: 5, kind: input, shape index: {}]   ;;  %s1028_s6 = inlined_call_operand.vmem [shape: f32[1,128], index: 6, kind: input, shape index: {}]   ;;  %s1029_s7 = inlined_call_operand.vmem [shape: f32[1,128], index: 7, kind: input, shape index: {}]   ;;  %s1030_s8 = inlined_call_operand.vmem [shape: f32[1,128], index: 8, kind: input, shape index: {}]   ;;  %s1031_s9 = inlined_call_operand.hbm [shape: f32[128,128], index: 9, kind: input, shape index: {}]   ;;  %s1032_s10 = inlined_call_operand.vmem [shape: f32[1,128], index: 10, kind: input, shape index: {}]   ;;  %s1033_s11 = inlined_call_operand.vmem [shape: f32[1,128], index: 11, kind: input, shape index: {}]   ;;  %s1034_s12 = inlined_call_operand.vmem [shape: f32[1,128], index: 12, kind: input, shape index: {}]   ;;  %s1035_s13 = inlined_call_operand.hbm [shape: f32[8,128], index: 13, kind: output, shape index: {}]  }
   0x1   :  { %19 = vsyncpa [#allocation6], 0 }
   0x2   :  { %20 = vsyncpa [#allocation4], 0  ;;  %s822_s25 = smov [#allocation5]   ;;  %s823_s27 = smov [#allocation2]  }
   0x3   :  { %s46_s26 = sshll.u32 %s822_s25, 4  ;;  %s28_s28 = sshll.u32 %s823_s27, 4  ;;  %s47_s26 = int_to_ptr.vmem [resolvable:$true] %s46_s26  ;;  %s901_s28 = int_to_ptr.vmem [resolvable:$true] %s28_s28 }
   0x4   :  { %s728_s14 = scalar_lea.hbm %s1027_s5, 2048 }
   0x5   :  { %p729_p0 = scmp.ne.s32.totalorder %s1027_s5, %s728_s14  ;;  %p732_p1 = scmp.lt.u32.totalorder %s728_s14, %s1027_s5 }
   0x7   :  { %p734_p2 = pnand %p732_p1, %p729_p0 }
   0x9   :  { %737 = shalt.err (!%p734_p2)
}
   0xa   :  { %s738_s19 = scalar_lea.vmem %s47_s26, 2048  ;;  %p743_p4 = scmp.lt.s32.totalorder %s47_s26, %s47_s26 }
   0xb   :  { %p739_p3 = scmp.ne.s32.totalorder %s47_s26, %s738_s19  ;;  %p744_p5 = scmp.lt.s32.totalorder %s738_s19, %s738_s19 }
   0xd   :  { %p745_p6 = por %p744_p5, %p743_p4 }
   0xf   :  { %p746_p7 = pnand %p745_p6, %p739_p3 }
  0x11   :  { %749 = shalt.err (!%p746_p7)
}
  0x12   :  { %s824_s20 = smov 128   ;;  %s825_s21 = smov 8  }
  0x13   :  { %52 = dma.hbm_to_vmem [thread:$0]  %s1027_s5, 2048, %s47_s26, [#allocation6], %s824_s20, %s824_s20, %s825_s21  }
  0x14   :  { %s750_s27 = scalar_lea.hbm %s1023_s1, 2048 }
  0x15   :  { %p751_p8 = scmp.ne.s32.totalorder %s1023_s1, %s750_s27  ;;  %p754_p9 = scmp.lt.u32.totalorder %s750_s27, %s1023_s1 }
  0x17   :  { %p756_p10 = pnand %p754_p9, %p751_p8 }
  0x19   :  { %759 = shalt.err (!%p756_p10)
}
  0x1a   :  { %s760_s16 = scalar_lea.vmem %s901_s28, 2048  ;;  %p765_p12 = scmp.lt.s32.totalorder %s901_s28, %s901_s28 }
  0x1b   :  { %p761_p11 = scmp.ne.s32.totalorder %s901_s28, %s760_s16  ;;  %p766_p13 = scmp.lt.s32.totalorder %s760_s16, %s760_s16 }
  0x1d   :  { %p767_p0 = por %p766_p13, %p765_p12 }
  0x1f   :  { %p768_p1 = pnand %p767_p0, %p761_p11 }
  0x21   :  { %771 = shalt.err (!%p768_p1)
}
  0x22   :  { %34 = dma.hbm_to_vmem [thread:$0]  %s1023_s1, 2048, %s901_s28, [#allocation3], %s824_s20, %s824_s20, %s825_s21  }
  0x23   :  { %s826_s17 = smov [#allocation7]   ;;  %s772_s23 = scalar_lea.hbm %s1031_s9, 2048 }
  0x24   :  { %s64_s18 = sshll.u32 %s826_s17, 4  ;;  %p773_p2 = scmp.ne.s32.totalorder %s1031_s9, %s772_s23  ;;  %s65_s18 = int_to_ptr.vmem [resolvable:$true] %s64_s18 }
  0x25   :  { %p776_p3 = scmp.lt.u32.totalorder %s772_s23, %s1031_s9 }
  0x27   :  { %p778_p4 = pnand %p776_p3, %p773_p2 }
  0x29   :  { %781 = shalt.err (!%p778_p4)
}
  0x2a   :  { %s782_s30 = scalar_lea.vmem %s65_s18, 2048  ;;  %p787_p6 = scmp.lt.s32.totalorder %s65_s18, %s65_s18 }
  0x2b   :  { %p783_p5 = scmp.ne.s32.totalorder %s65_s18, %s782_s30  ;;  %p788_p7 = scmp.lt.s32.totalorder %s782_s30, %s782_s30 }
  0x2d   :  { %p789_p8 = por %p788_p7, %p787_p6 }
  0x2f   :  { %p790_p9 = pnand %p789_p8, %p783_p5 }
  0x31   :  { %793 = shalt.err (!%p790_p9)
}
  0x32   :  { %70 = dma.hbm_to_vmem [thread:$0]  %s1031_s9, 2048, %s65_s18, [#allocation6], %s824_s20, %s824_s20, %s825_s21  }
  0x33   :  { %816 = dma.done.wait [#allocation3], 2048  }
  0x34   :  { %817 = vsyncadd [#allocation3], 4294965248 }
  0x35   :  { %818 = dma.done.wait [#allocation6], 4096  }
  0x36   :  { %819 = vsyncadd [#allocation6], 4294963200  ;;  %v827_v0 = vmov 0.0|0.0   ;;  %vm828_vm0 = vmmov 0   ;;  %v829_v1 = vmov 0.0   ;;  %v87_v2 = vld [vmem:[#allocation2] sm:$0xff] }
  0x37   :  { %641 = vmatprep.subr.bf16.mxu0 %v827_v0  ;;  %568 = vmatprep.mubr.msk.f32.mxu0 %vm828_vm0, %v829_v1  ;;  %v88_v3 = vld [vmem:[#allocation2 + $0x8] sm:$0xff]  ;;  %v89_v4 = vld [vmem:[#allocation2 + $0x10] sm:$0xff]  ;;  %v90_v6 = vld [vmem:[#allocation2 + $0x18] sm:$0xff]  ;;  %s830_s23 = smov [#allocation8]  }
  0x38   :  { %665 = vmatprep.subr.bf16.mxu1 %v827_v0  ;;  %603 = vmatprep.mubr.msk.f32.mxu1 %vm828_vm0, %v829_v1  ;;  %v642_v5 = vpack.c.bf16 %v88_v3, %v87_v2  ;;  %v645_v7 = vpack.c.bf16 %v90_v6, %v89_v4  ;;  %v91_v8 = vld [vmem:[#allocation2 + $0x20] sm:$0xff]  ;;  %v92_v9 = vld [vmem:[#allocation2 + $0x28] sm:$0xff]  ;;  %v93_v11 = vld [vmem:[#allocation2 + $0x30] sm:$0xff]  ;;  %s466_s24 = sshll.u32 %s830_s23, 4  ;;  %s467_s24 = int_to_ptr.vmem [resolvable:$true] %s466_s24 }
  0x39   :  { %v648_v10 = vpack.c.bf16 %v92_v9, %v91_v8  ;;  %v94_v12 = vld [vmem:[#allocation2 + $0x38] sm:$0xff]  ;;  %v95_v14 = vld [vmem:[#allocation2 + $0x40] sm:$0xff]  ;;  %v96_v15 = vld [vmem:[#allocation2 + $0x48] sm:$0xff]  ;;  %s794_s25 = scalar_lea.vmem %s467_s24, 128  ;;  %p799_p11 = scmp.lt.s32.totalorder %s467_s24, %s467_s24 }
  0x3a   :  { %643 = vmatpush3.bf16.msra.mxu0 %v642_v5  ;;  %v651_v13 = vpack.c.bf16 %v94_v12, %v93_v11  ;;  %v654_v16 = vpack.c.bf16 %v96_v15, %v95_v14  ;;  %v97_v17 = vld [vmem:[#allocation2 + $0x50] sm:$0xff]  ;;  %v98_v18 = vld [vmem:[#allocation2 + $0x58] sm:$0xff]  ;;  %v99_v20 = vld [vmem:[#allocation2 + $0x60] sm:$0xff]  ;;  %p795_p10 = scmp.ne.s32.totalorder %s467_s24, %s794_s25  ;;  %p800_p12 = scmp.lt.s32.totalorder %s794_s25, %s794_s25 }
  0x3b   :  { %644 = vmatprep.subr.bf16.mxu0 %v827_v0  ;;  %v657_v19 = vpack.c.bf16 %v98_v18, %v97_v17  ;;  %v100_v21 = vld [vmem:[#allocation2 + $0x68] sm:$0xff]  ;;  %v101_v23 = vld [vmem:[#allocation2 + $0x70] sm:$0xff]  ;;  %v102_v24 = vld [vmem:[#allocation2 + $0x78] sm:$0xff] }
  0x3c   :  { %v660_v22 = vpack.c.bf16 %v100_v21, %v99_v20  ;;  %v663_v25 = vpack.c.bf16 %v102_v24, %v101_v23  ;;  %v86_v26 = vld [vmem:[%s1022_s0] sm:$0xff]  ;;  %v212_v33 = vld [vmem:[#allocation5 + $0x8] sm:$0xff]  ;;  %v213_v35 = vld [vmem:[#allocation5 + $0x10] sm:$0xff]  ;;  %p801_p13 = por %p800_p12, %p799_p11 }
  0x3d   :  { %v476_v27 = vld [vmem:[%s1024_s2] ss:$0 sm:$0xff]  ;;  %v214_v36 = vld [vmem:[#allocation5 + $0x18] sm:$0xff]  ;;  %v216_v39 = vld [vmem:[#allocation5 + $0x28] sm:$0xff] }
  0x3e   :  { %646 = vmatpush3.bf16.msra.mxu0 %v645_v7  ;;  %v211_v32 = vld [vmem:[#allocation5] sm:$0xff]  ;;  %v669_v37 = vpack.c.bf16 %v214_v36, %v213_v35  ;;  %v217_v41 = vld [vmem:[#allocation5 + $0x30] sm:$0xff]  ;;  %v218_v42 = vld [vmem:[#allocation5 + $0x38] sm:$0xff]  ;;  %p802_p0 = pnand %p801_p13, %p795_p10 }
  0x3f   :  { %647 = vmatprep.subr.bf16.mxu0 %v827_v0  ;;  %v666_v34 = vpack.c.bf16 %v212_v33, %v211_v32  ;;  %v215_v38 = vld [vmem:[#allocation5 + $0x20] sm:$0xff]  ;;  %v675_v43 = vpack.c.bf16 %v218_v42, %v217_v41  ;;  %v220_v45 = vld [vmem:[#allocation5 + $0x48] sm:$0xff]  ;;  %v221_v47 = vld [vmem:[#allocation5 + $0x50] sm:$0xff] }
  0x40   :  { %v672_v40 = vpack.c.bf16 %v216_v39, %v215_v38  ;;  %v219_v44 = vld [vmem:[#allocation5 + $0x40] sm:$0xff]  ;;  %v222_v48 = vld [vmem:[#allocation5 + $0x58] sm:$0xff]  ;;  %v224_v51 = vld [vmem:[#allocation5 + $0x68] sm:$0xff] }
  0x41   :  { %667 = vmatpush3.bf16.msra.mxu1 %v666_v34  ;;  %v678_v46 = vpack.c.bf16 %v220_v45, %v219_v44  ;;  %v681_v49 = vpack.c.bf16 %v222_v48, %v221_v47  ;;  %v223_v50 = vld [vmem:[#allocation5 + $0x60] sm:$0xff]  ;;  %v225_v53 = vld [vmem:[#allocation5 + $0x70] sm:$0xff]  ;;  %v226_v54 = vld [vmem:[#allocation5 + $0x78] sm:$0xff] }
  0x42   :  { %649 = vmatpush3.bf16.msra.mxu0 %v648_v10  ;;  %668 = vmatprep.subr.bf16.mxu1 %v827_v0  ;;  %v684_v52 = vpack.c.bf16 %v224_v51, %v223_v50  ;;  %v687_v55 = vpack.c.bf16 %v226_v54, %v225_v53  ;;  %v477_v3 = vld [vmem:[%s1025_s3] ss:$0 sm:$0xff]  ;;  %v336_v15 = vld [vmem:[#allocation7 + $0x8] sm:$0xff]  ;;  %v337_v17 = vld [vmem:[#allocation7 + $0x10] sm:$0xff] }
  0x43   :  { %650 = vmatprep.subr.bf16.mxu0 %v827_v0  ;;  %v478_v5 = vld [vmem:[%s1026_s4] ss:$0 sm:$0xff]  ;;  %v338_v18 = vld [vmem:[#allocation7 + $0x18] sm:$0xff]  ;;  %v340_v21 = vld [vmem:[#allocation7 + $0x28] sm:$0xff] }
  0x44   :  { %v479_v9 = vld [vmem:[%s1028_s6] ss:$0 sm:$0xff]  ;;  %v341_v23 = vld [vmem:[#allocation7 + $0x30] sm:$0xff]  ;;  %v342_v24 = vld [vmem:[#allocation7 + $0x38] sm:$0xff] }
  0x45   :  { %670 = vmatpush3.bf16.msra.mxu1 %v669_v37  ;;  %v335_v14 = vld [vmem:[#allocation7] sm:$0xff]  ;;  %v348_v33 = vld [vmem:[#allocation7 + $0x68] sm:$0xff]  ;;  %v349_v35 = vld [vmem:[#allocation7 + $0x70] sm:$0xff] }
  0x46   :  { %652 = vmatpush3.bf16.msra.mxu0 %v651_v13  ;;  %671 = vmatprep.subr.bf16.mxu1 %v827_v0  ;;  %v339_v20 = vld [vmem:[#allocation7 + $0x20] sm:$0xff]  ;;  %v350_v36 = vld [vmem:[#allocation7 + $0x78] sm:$0xff] }
  0x47   :  { %653 = vmatprep.subr.bf16.mxu0 %v827_v0  ;;  %v347_v32 = vld [vmem:[#allocation7 + $0x60] sm:$0xff]  ;;  %v711_v37 = vpack.c.bf16 %v350_v36, %v349_v35 }
  0x48   :  { %v708_v34 = vpack.c.bf16 %v348_v33, %v347_v32  ;;  %v480_v48 = vld [vmem:[%s1029_s7] ss:$0 sm:$0xff] }
  0x49   :  { %673 = vmatpush3.bf16.msra.mxu1 %v672_v40  ;;  %v482_v53 = vld [vmem:[%s1032_s10] ss:$0 sm:$0xff] }
  0x4a   :  { %655 = vmatpush3.bf16.msra.mxu0 %v654_v16  ;;  %674 = vmatprep.subr.bf16.mxu1 %v827_v0  ;;  %v690_v16 = vpack.c.bf16 %v336_v15, %v335_v14 }
  0x4b   :  { %656 = vmatprep.subr.bf16.mxu0 %v827_v0 }
  0x4d   :  { %676 = vmatpush3.bf16.msra.mxu1 %v675_v43 }
  0x4e   :  { %658 = vmatpush3.bf16.msra.mxu0 %v657_v19  ;;  %677 = vmatprep.subr.bf16.mxu1 %v827_v0  ;;  %v693_v19 = vpack.c.bf16 %v338_v18, %v337_v17 }
  0x4f   :  { %659 = vmatprep.subr.bf16.mxu0 %v827_v0 }
  0x51   :  { %679 = vmatpush3.bf16.msra.mxu1 %v678_v46 }
  0x52   :  { %661 = vmatpush3.bf16.msra.mxu0 %v660_v22  ;;  %680 = vmatprep.subr.bf16.mxu1 %v827_v0  ;;  %v696_v22 = vpack.c.bf16 %v340_v21, %v339_v20 }
  0x53   :  { %662 = vmatprep.subr.bf16.mxu0 %v827_v0 }
  0x55   :  { %682 = vmatpush3.bf16.msra.mxu1 %v681_v49 }
  0x56   :  { %664 = vmatpush3.bf16.msra.mxu0 %v663_v25  ;;  %683 = vmatprep.subr.bf16.mxu1 %v827_v0  ;;  %v699_v25 = vpack.c.bf16 %v342_v24, %v341_v23 }
  0x57   :  { %689 = vmatprep.subr.bf16.mxu0 %v827_v0 }
  0x59   :  { %569 = vmatmul.mubr.f32.vlgmr.msra.gmra.mrb[0].mxu0 %v86_v26  ;;  %685 = vmatpush3.bf16.msra.mxu1 %v684_v52  ;;  %v343_v26 = vld [vmem:[#allocation7 + $0x40] sm:$0xff] }
  0x5a   :  { %638 = vmatprep.mubr.msk.f32.mxu0 %vm828_vm0, %v829_v1  ;;  %686 = vmatprep.subr.bf16.mxu1 %v827_v0 }
  0x5b   :  { %691 = vmatpush3.bf16.msra.mxu0 %v690_v16 }
  0x5c   :  { %692 = vmatprep.subr.bf16.mxu0 %v827_v0 }
  0x5d   :  { %688 = vmatpush3.bf16.msra.mxu1 %v687_v55 }
  0x5f   :  { %694 = vmatpush3.bf16.msra.mxu0 %v693_v19 }
  0x60   :  { %695 = vmatprep.subr.bf16.mxu0 %v827_v0 }
  0x63   :  { %697 = vmatpush3.bf16.msra.mxu0 %v696_v22 }
  0x64   :  { %698 = vmatprep.subr.bf16.mxu0 %v827_v0 }
  0x67   :  { %700 = vmatpush3.bf16.msra.mxu0 %v699_v25 }
  0x68   :  { %701 = vmatprep.subr.bf16.mxu0 %v827_v0 }
 0x12c   :  { %v176_v28 = vpop.f32.mrb[0].mxu0 }
 0x12d   :  { %v177_v29 = vadd.f32 %v476_v27, %v176_v28  ;;  %v570_v30 = vpop.f32.mrb[1].mxu0  ;;  %v344_v27 = vld [vmem:[#allocation7 + $0x48] sm:$0xff] }
 0x12e   :  { %v702_v28 = vpack.c.bf16 %v344_v27, %v343_v26  ;;  %v346_v30 = vld [vmem:[#allocation7 + $0x58] sm:$0xff] }
 0x12f   :  { %180 = vadd.xlane.f32.xlu0 %v177_v29  ;;  %v182_v31 = vmul.f32 %v177_v29, %v177_v29 }
 0x130   :  { %703 = vmatpush3.bf16.msra.mxu0 %v702_v28 }
 0x131   :  { %704 = vmatprep.subr.bf16.mxu0 %v827_v0 }
 0x133   :  { %183 = vadd.xlane.f32.xlu0 %v182_v31 }
 0x1bc   :  { %v181_v56 = vpop.xlane.xlu0 %180 }
 0x1bd   :  { %v185_v57 = vmul.f32 0.015625, %v181_v56 }
 0x1bf   :  { %v187_v59 = vmul.f32 %v185_v57, %v185_v57  ;;  %v190_v1 = vsub.f32 %v177_v29, %v185_v57  ;;  %v345_v29 = vld [vmem:[#allocation7 + $0x50] sm:$0xff] }
 0x1c0   :  { %v184_v58 = vpop.xlane.xlu0 %183  ;;  %v705_v31 = vpack.c.bf16 %v346_v30, %v345_v29 }
 0x1c1   :  { %v186_v60 = vmul.f32 0.015625, %v184_v58 }
 0x1c2   :  { %706 = vmatpush3.bf16.msra.mxu0 %v705_v31 }
 0x1c3   :  { %v188_v61 = vsub.f32 %v186_v60, %v187_v59  ;;  %707 = vmatprep.subr.bf16.mxu0 %v827_v0 }
 0x1c5   :  { %v189_v62 = vmax.f32 %v188_v61, 0.0 }
 0x1c6   :  { %709 = vmatpush3.bf16.msra.mxu0 %v708_v34 }
 0x1c7   :  { %v191_v63 = vadd.f32 1e-05, %v189_v62  ;;  %710 = vmatprep.subr.bf16.mxu0 %v827_v0  ;;  %v481_v0 = vld [vmem:[%s1030_s8] ss:$0 sm:$0xff] }
 0x1c9   :  { %722 = vrsqrt.f32 %v191_v63 }
 0x1ca   :  { %712 = vmatpush3.bf16.msra.mxu0 %v711_v37 }
 0x1d3   :  { %v723_v2 = vpop.eup %722 }
 0x1d4   :  { %v193_v4 = vmul.f32 %v723_v2, %v190_v1 }
 0x1d6   :  { %v201_v6 = vmul.f32 %v477_v3, %v193_v4 }
 0x1d8   :  { %v209_v7 = vadd.f32 %v478_v5, %v201_v6  ;;  %v483_v5 = vld [vmem:[%s1033_s11] ss:$0 sm:$0xff] }
 0x1da   :  { %v210_v8 = vmax.f32 %v209_v7, 0.0  ;;  %v484_v7 = vld [vmem:[%s1034_s12] ss:$0 sm:$0xff] }
 0x1dc   :  { %604 = vmatmul.mubr.f32.vlgmr.msra.gmra.mrb[0].mxu1 %v210_v8 }
 0x2af   :  { %v300_v10 = vpop.f32.mrb[0].mxu1 }
 0x2b0   :  { %v301_v11 = vadd.f32 %v479_v9, %v300_v10  ;;  %v605_v12 = vpop.f32.mrb[1].mxu1 }
 0x2b2   :  { %304 = vadd.xlane.f32.xlu1 %v301_v11  ;;  %v306_v13 = vmul.f32 %v301_v11, %v301_v11 }
 0x2b6   :  { %307 = vadd.xlane.f32.xlu1 %v306_v13 }
 0x33f   :  { %v305_v38 = vpop.xlane.xlu1 %304 }
 0x340   :  { %v309_v39 = vmul.f32 0.03125, %v305_v38 }
 0x342   :  { %v311_v41 = vmul.f32 %v309_v39, %v309_v39  ;;  %v314_v46 = vsub.f32 %v301_v11, %v309_v39 }
 0x343   :  { %v308_v40 = vpop.xlane.xlu1 %307 }
 0x344   :  { %v310_v42 = vmul.f32 0.03125, %v308_v40 }
 0x346   :  { %v312_v43 = vsub.f32 %v310_v42, %v311_v41 }
 0x348   :  { %v313_v44 = vmax.f32 %v312_v43, 0.0 }
 0x34a   :  { %v315_v45 = vadd.f32 1e-05, %v313_v44 }
 0x34c   :  { %724 = vrsqrt.f32 %v315_v45 }
 0x356   :  { %v725_v47 = vpop.eup %724 }
 0x357   :  { %v317_v49 = vmul.f32 %v725_v47, %v314_v46 }
 0x359   :  { %v325_v50 = vmul.f32 %v480_v48, %v317_v49 }
 0x35b   :  { %v333_v51 = vadd.f32 %v481_v0, %v325_v50 }
 0x35d   :  { %v334_v52 = vmax.f32 %v333_v51, 0.0 }
 0x35f   :  { %639 = vmatmul.mubr.f32.vlgmr.msra.gmra.mrb[2].mxu0 %v334_v52 }
 0x432   :  { %v424_v54 = vpop.f32.mrb[2].mxu0 }
 0x433   :  { %v425_v55 = vadd.f32 %v482_v53, %v424_v54  ;;  %v640_v56 = vpop.f32.mrb[3].mxu0 }
 0x435   :  { %428 = vadd.xlane.f32.xlu0 %v425_v55  ;;  %v430_v57 = vmul.f32 %v425_v55, %v425_v55 }
 0x437   :  { %431 = vadd.xlane.f32.xlu1 %v430_v57 }
 0x4c2   :  { %v429_v58 = vpop.xlane.xlu0 %428 }
 0x4c3   :  { %v433_v59 = vmul.f32 0.0625, %v429_v58 }
 0x4c4   :  { %v432_v60 = vpop.xlane.xlu1 %431 }
 0x4c5   :  { %v435_v61 = vmul.f32 %v433_v59, %v433_v59  ;;  %v434_v62 = vmul.f32 0.0625, %v432_v60  ;;  %v438_v3 = vsub.f32 %v425_v55, %v433_v59 }
 0x4c7   :  { %v436_v63 = vsub.f32 %v434_v62, %v435_v61 }
 0x4c9   :  { %v437_v1 = vmax.f32 %v436_v63, 0.0 }
 0x4cb   :  { %v439_v2 = vadd.f32 1e-05, %v437_v1 }
 0x4cd   :  { %726 = vrsqrt.f32 %v439_v2 }
 0x4d7   :  { %v727_v4 = vpop.eup %726 }
 0x4d8   :  { %v441_v6 = vmul.f32 %v727_v4, %v438_v3 }
 0x4da   :  { %v449_v8 = vmul.f32 %v483_v5, %v441_v6 }
 0x4dc   :  { %v457_v9 = vadd.f32 %v484_v7, %v449_v8 }
 0x4de   :  { %v458_v10 = vmax.f32 %v457_v9, 0.0 }
 0x4e0   :  { %459 = vst [vmem:[#allocation8] sm:$0xff] %v458_v10 }
 0x4e1   :  { %805 = shalt.err (!%p802_p0)
}
 0x4e2   :  { %s806_s29 = scalar_lea.hbm %s1035_s13, 128 }
 0x4e3   :  { %p807_p1 = scmp.ne.s32.totalorder %s1035_s13, %s806_s29  ;;  %p810_p2 = scmp.lt.u32.totalorder %s806_s29, %s1035_s13 }
 0x4e5   :  { %p812_p3 = pnand %p810_p2, %p807_p1 }
 0x4e7   :  { %815 = shalt.err (!%p812_p3)
}
 0x4e8   :  { %469 = dma.vmem_to_hbm [thread:$0]  %s467_s24, 128, %s1035_s13, [#allocation4]  }
 0x4e9   :  { %820 = dma.done.wait [#allocation4], 128  }
 0x4ea   :  { %821 = vsyncadd [#allocation4], 4294967168 }
 0x4eb   :  { %473 = vsyncpa [#allocation3], 1 }
 0x4ec   :  { %474 = vsyncpa [#allocation6], 1 }
 0x4ed   :  { %475 = vsyncpa [#allocation4], 1 }

</bundles_post_ra>
